<compile_context>
chip_gen: v6e
topology: v6e:2x2x1
jax: 0.10.0
libtpu: 0.0.40
codegen_flags: <defaults>
</compile_context>

<pallas_src>
import functools

import jax
import jax.numpy as jnp
from jax import lax
from jax.experimental import pallas as pl
from jax.experimental.pallas import tpu as pltpu


def _round_up(x, m):
    return ((x + m - 1) // m) * m


def _pick_tile(total, target):
    """Largest power-of-two-ish tile <= target that divides `total`."""
    if total <= target:
        return total
    t = target
    while total % t:
        t //= 2
    return t


# --------------------------------------------------------------------------
# Phase 1: batched input projection  pre = x_flat @ W_ih.T + bias   (parallel)
# --------------------------------------------------------------------------
def _indrnn_proj_kernel(x_ref, w_ref, b_ref, pre_ref):
    # One (TM, I) x (I, TN) MXU GEMM per grid cell, bias folded in, f32 accum.
    pre_ref[...] = (
        jnp.dot(x_ref[...], w_ref[...], preferred_element_type=jnp.float32)
        + b_ref[...]
    )


# --------------------------------------------------------------------------
# Phase 2: sequential elementwise recurrence, TT timesteps per grid step
# --------------------------------------------------------------------------
def _indrnn_rec_kernel(pre_ref, w_hh_ref, hx_ref, out_ref, h_scratch,
                       *, tt, activation):
    c = pl.program_id(1)  # time-chunk index (innermost, sequential)

    @pl.when(c == 0)
    def _():
        h_scratch[...] = hx_ref[...].astype(jnp.float32)

    # Hoist the (1, TH) -> (B, TH) broadcast out of the per-step loop
    # (JAX does not CSE broadcast_in_dim across loop iterations).
    w_hh = jnp.broadcast_to(w_hh_ref[...], h_scratch.shape)

    def step(i, h):
        h_new = activation(pre_ref[i] + w_hh * h)
        out_ref[i] = h_new.astype(out_ref.dtype)
        return h_new

    h_scratch[...] = lax.fori_loop(0, tt, step, h_scratch[...], unroll=True)


# --------------------------------------------------------------------------
# Wrappers
# --------------------------------------------------------------------------
def indrnn_sequence_forward(x_seq, weight_ih, weight_hh, bias_ih, hx,
                            *, activation="relu", out_dtype=jnp.float32,
                            matmul_dtype=jnp.bfloat16, time_chunk=16):
    """Run the IndRNN cell over a whole sequence.

    x_seq: (T, B, I), weight_ih: (H, I), weight_hh: (H,), bias_ih: (H,) or None,
    hx: (B, H).  Returns the hidden-state sequence (T, B, H); [-1] is the final
    hidden state.
    """
    T, B, I = x_seq.shape
    H = weight_ih.shape[0]
    if bias_ih is None:                      # module built with bias=False
        bias_ih = jnp.zeros((H,), jnp.float32)

    if activation == "tanh":
        act = jnp.tanh
    else:                                    # module falls back to ReLU otherwise
        act = lambda v: jnp.maximum(v, 0.0)

    # ---- pad to TPU-friendly shapes (8 sublanes / 128 lanes) -------------
    B_pad = _round_up(B, 8)
    H_pad = _round_up(H, 128)
    TT = max(1, min(time_chunk, T))
    T_pad = _round_up(T, TT)

    x_p = jnp.zeros((T_pad, B_pad, I), x_seq.dtype).at[:T, :B].set(x_seq)
    hx_p = jnp.zeros((B_pad, H_pad), jnp.float32).at[:B, :H].set(
        hx.astype(jnp.float32))
    w_ih_t = jnp.zeros((I, H_pad), jnp.float32).at[:, :H].set(
        jnp.transpose(weight_ih).astype(jnp.float32))
    w_ih_t = w_ih_t.astype(matmul_dtype)                       # bf16 weight
    bias_p = jnp.zeros((1, H_pad), jnp.float32).at[0, :H].set(
        bias_ih.astype(jnp.float32))                           # f32 (explicit)
    w_hh_p = jnp.zeros((1, H_pad), jnp.float32).at[0, :H].set(
        weight_hh.astype(jnp.float32))                         # f32 (explicit)

    # ---- phase 1: one big GEMM over all timesteps -------------------------
    M = T_pad * B_pad
    TM = min(256, M)
    M_pad = _round_up(M, TM)
    x_flat = jnp.zeros((M_pad, I), matmul_dtype).at[:M].set(
        x_p.reshape(M, I).astype(matmul_dtype))
    TN = _pick_tile(H_pad, 512)

    pre_flat = pl.pallas_call(
        _indrnn_proj_kernel,
        out_shape=jax.ShapeDtypeStruct((M_pad, H_pad), jnp.float32),
        grid=(M_pad // TM, H_pad // TN),
        in_specs=[
            pl.BlockSpec((TM, I), lambda m, n: (m, 0)),    # x rows stream in
            pl.BlockSpec((I, TN), lambda m, n: (0, n)),    # weight column tile
            pl.BlockSpec((1, TN), lambda m, n: (0, n)),    # bias column tile
        ],
        out_specs=pl.BlockSpec((TM, TN), lambda m, n: (m, n)),
        compiler_params=pltpu.CompilerParams(
            dimension_semantics=("parallel", "parallel")),
    )(x_flat, w_ih_t, bias_p)

    pre_seq = pre_flat[:M].reshape(T_pad, B_pad, H_pad)

    # ---- phase 2: elementwise recurrence over time chunks ------------------
    TH = _pick_tile(H_pad, 512)

    out_p = pl.pallas_call(
        functools.partial(_indrnn_rec_kernel, tt=TT, activation=act),
        out_shape=jax.ShapeDtypeStruct((T_pad, B_pad, H_pad), out_dtype),
        grid=(H_pad // TH, T_pad // TT),
        in_specs=[
            pl.BlockSpec((TT, B_pad, TH), lambda j, c: (c, 0, j)),  # pre slab
            pl.BlockSpec((1, TH), lambda j, c: (0, j)),             # w_hh (resident)
            pl.BlockSpec((B_pad, TH), lambda j, c: (0, j)),         # hx (resident)
        ],
        out_specs=pl.BlockSpec((TT, B_pad, TH), lambda j, c: (c, 0, j)),
        scratch_shapes=[pltpu.VMEM((B_pad, TH), jnp.float32)],      # carried h
        compiler_params=pltpu.CompilerParams(
            dimension_semantics=("parallel", "arbitrary")),         # H ∥, time seq
    )(pre_seq, w_hh_p, hx_p)

    return out_p[:T, :B, :H]


def indrnn_cell_forward(x, weight_ih, weight_hh, bias_ih, hx, **kwargs):
    """Exact single-step module forward: act(x @ W_ih.T + b + w_hh * hx)."""
    out_seq = indrnn_sequence_forward(x[None], weight_ih, weight_hh, bias_ih,
                                      hx, **kwargs)
    return out_seq[0]


if __name__ == "__main__":
    T, B, INPUT_SIZE, HIDDEN_SIZE = 8, 8, 64, 128

    key = jax.random.PRNGKey(0)
    k_x, k_h, k_w = jax.random.split(key, 3)

    # Deterministic parameter init matching the module's __init__:
    #   weight_ih ~ N(0, 0.01), weight_hh = 1, bias_ih = 0
    weight_ih = 0.01 * jax.random.normal(k_w, (HIDDEN_SIZE, INPUT_SIZE),
                                         dtype=jnp.float32)
    weight_hh = jnp.ones((HIDDEN_SIZE,), dtype=jnp.float32)
    bias_ih = jnp.zeros((HIDDEN_SIZE,), dtype=jnp.float32)

    x_seq = jax.random.normal(k_x, (T, B, INPUT_SIZE), dtype=jnp.float32)
    hx = jax.random.normal(k_h, (B, HIDDEN_SIZE), dtype=jnp.float32)

    out_seq = jax.block_until_ready(
        indrnn_sequence_forward(x_seq, weight_ih, weight_hh, bias_ih, hx))
    assert out_seq.shape == (T, B, HIDDEN_SIZE)

    # Reference 1: identical math (bf16 operands, f32 accumulate) — tight check.
    w_bf16 = weight_ih.astype(jnp.bfloat16)

    def step_bf16(h, x_t):
        pre = jnp.dot(x_t.astype(jnp.bfloat16), w_bf16.T,
                      preferred_element_type=jnp.float32) + bias_ih
        h_new = jnp.maximum(pre + weight_hh * h, 0.0)
        return h_new, h_new

    _, ref_bf16 = lax.scan(step_bf16, hx, x_seq)
    err_bf16 = float(jnp.max(jnp.abs(out_seq - ref_bf16)))
    assert jnp.allclose(out_seq, ref_bf16, atol=1e-4, rtol=1e-4), err_bf16

    # Reference 2: full-f32 module semantics — loose check (bf16 rounding only).
    def step_f32(h, x_t):
        h_new = jnp.maximum(x_t @ weight_ih.T + bias_ih + weight_hh * h, 0.0)
        return h_new, h_new

    _, ref_f32 = lax.scan(step_f32, hx, x_seq)
    err_f32 = float(jnp.max(jnp.abs(out_seq - ref_f32)))
    assert jnp.allclose(out_seq, ref_f32, atol=5e-2, rtol=0.0), err_f32

    # Single-step module forward (T=1 path) also matches.
    out1 = jax.block_until_ready(
        indrnn_cell_forward(x_seq[0], weight_ih, weight_hh, bias_ih, hx))
    ref1 = step_bf16(hx, x_seq[0])[0]
    assert jnp.allclose(out1, ref1, atol=1e-4, rtol=1e-4)

    print("KERNEL_OK")
</pallas_src>

<mosaic_0001>
module attributes {stable_mosaic.version = 11 : i64} {
  func.func @_indrnn_proj_kernel(%arg0: i32, %arg1: i32, %arg2: memref<64x64xbf16, #tpu.memory_space<vmem>>, %arg3: memref<64x128xbf16, #tpu.memory_space<vmem>>, %arg4: memref<1x128xf32, #tpu.memory_space<vmem>>, %arg5: memref<64x128xf32, #tpu.memory_space<vmem>>) attributes {dimension_semantics = [#tpu.dimension_semantics<parallel>, #tpu.dimension_semantics<parallel>], iteration_bounds = array<i64: 1, 1>, scalar_prefetch = 0 : i64, scratch_operands = 0 : i64, tpu.core_type = #tpu.core_type<tc>, window_params = [{transform_indices = @transform_0, window_bounds = array<i64: 64, 64>}, {transform_indices = @transform_1, window_bounds = array<i64: 64, 128>}, {transform_indices = @transform_2, window_bounds = array<i64: 1, 128>}, {transform_indices = @transform_3, window_bounds = array<i64: 64, 128>}]} {
    %c0 = arith.constant 0 : index
    %c0_0 = arith.constant 0 : index
    %0 = vector.load %arg2[%c0, %c0_0] : memref<64x64xbf16, #tpu.memory_space<vmem>>, vector<64x64xbf16>
    %c0_1 = arith.constant 0 : index
    %c0_2 = arith.constant 0 : index
    %1 = vector.load %arg3[%c0_1, %c0_2] : memref<64x128xbf16, #tpu.memory_space<vmem>>, vector<64x128xbf16>
    %cst = arith.constant dense<0.000000e+00> : vector<64x128xf32>
    %2 = tpu.matmul %0, %1, %cst {dimension_numbers = #tpu.dot_dimension_numbers<[1], [0], [0], [1], [0, 0, 1, 1], [], []>} : vector<64x64xbf16>, vector<64x128xbf16>, vector<64x128xf32> -> vector<64x128xf32>
    %c0_3 = arith.constant 0 : index
    %c0_4 = arith.constant 0 : index
    %3 = vector.load %arg4[%c0_3, %c0_4] : memref<1x128xf32, #tpu.memory_space<vmem>>, vector<1x128xf32>
    %4 = vector.broadcast %3 : vector<1x128xf32> to vector<64x128xf32>
    %5 = arith.addf %2, %4 : vector<64x128xf32>
    %c0_5 = arith.constant 0 : index
    %c0_6 = arith.constant 0 : index
    %6 = vector.load %arg5[%c0_5, %c0_6] : memref<64x128xf32, #tpu.memory_space<vmem>>, vector<64x128xf32>
    tpu.vector_store %arg5[%c0_5, %c0_6], %5 {strides = array<i32>} : memref<64x128xf32, #tpu.memory_space<vmem>>, vector<64x128xf32>,
    return
  }
  func.func @transform_0(%arg0: i32, %arg1: i32) -> (i32, i32) {
    %c0_i32 = arith.constant 0 : i32
    %c0_i32_0 = arith.constant 0 : i32
    return %arg0, %c0_i32 : i32, i32
  }
  func.func @transform_1(%arg0: i32, %arg1: i32) -> (i32, i32) {
    %c0_i32 = arith.constant 0 : i32
    %c0_i32_0 = arith.constant 0 : i32
    return %c0_i32, %arg1 : i32, i32
  }
  func.func @transform_2(%arg0: i32, %arg1: i32) -> (i32, i32) {
    %c0_i32 = arith.constant 0 : i32
    %c0_i32_0 = arith.constant 0 : i32
    return %c0_i32, %arg1 : i32, i32
  }
  func.func @transform_3(%arg0: i32, %arg1: i32) -> (i32, i32) {
    %c0_i32 = arith.constant 0 : i32
    return %arg0, %arg1 : i32, i32
  }
}

</mosaic_0001>

<bundles_post_ra>
// kernel: tpu_custom_call.1
= control target key start
LH: loop header
LB: loop body
LE: loop exit
PB: predicated region body
PF: predicated region fallthrough
CT: control target
= control target key end

     0   :  { %8 = vsyncpa [#allocation3], 0  ;;  %s384_s0 = inlined_call_operand.hbm [shape: bf16[64,64], index: 0, kind: input, shape index: {}]   ;;  %s385_s1 = inlined_call_operand.hbm [shape: bf16[64,128], index: 1, kind: input, shape index: {}]   ;;  %s386_s2 = inlined_call_operand.vmem [shape: f32[1,128], index: 2, kind: input, shape index: {}]   ;;  %s387_s3 = inlined_call_operand.hbm [shape: f32[64,128], index: 3, kind: output, shape index: {}]  }
   0x1   :  { %9 = vsyncpa [#allocation6], 0 }
   0x2   :  { %10 = vsyncpa [#allocation4], 0  ;;  %s341_s12 = smov [#allocation2]  }
   0x3   :  { %s16_s13 = sshll.u32 %s341_s12, 4  ;;  %s17_s13 = int_to_ptr.vmem [resolvable:$true] %s16_s13 }
   0x4   :  { %s283_s14 = scalar_lea.vmem %s17_s13, 512  ;;  %p288_p1 = scmp.lt.s32.totalorder %s17_s13, %s17_s13 }
   0x5   :  { %p284_p0 = scmp.ne.s32.totalorder %s17_s13, %s283_s14  ;;  %p289_p2 = scmp.lt.s32.totalorder %s283_s14, %s283_s14 }
   0x7   :  { %p290_p3 = por %p289_p2, %p288_p1 }
   0x9   :  { %p291_p4 = pnand %p290_p3, %p284_p0 }
   0xb   :  { %294 = shalt.err (!%p291_p4)
}
   0xc   :  { %s342_s15 = smov 64   ;;  %s343_s16 = smov 4  }
   0xd   :  { %22 = dma.hbm_to_vmem [thread:$0]  %s384_s0, 512, %s17_s13, [#allocation3], %s342_s15, %s342_s15, %s343_s16  }
   0xe   :  { %s344_s19 = smov [#allocation5]  }
   0xf   :  { %s28_s20 = sshll.u32 %s344_s19, 4  ;;  %s29_s20 = int_to_ptr.vmem [resolvable:$true] %s28_s20 }
  0x10   :  { %s303_s21 = scalar_lea.vmem %s29_s20, 512  ;;  %p308_p6 = scmp.lt.s32.totalorder %s29_s20, %s29_s20 }
  0x11   :  { %p304_p5 = scmp.ne.s32.totalorder %s29_s20, %s303_s21  ;;  %p309_p7 = scmp.lt.s32.totalorder %s303_s21, %s303_s21 }
  0x13   :  { %p310_p8 = por %p309_p7, %p308_p6 }
  0x15   :  { %p311_p9 = pnand %p310_p8, %p304_p5 }
  0x17   :  { %314 = shalt.err (!%p311_p9)
}
  0x18   :  { %34 = dma.hbm_to_vmem [thread:$0]  %s385_s1, 512, %s29_s20, [#allocation6], %s342_s15, %s342_s15, %s343_s16  }
  0x19   :  { %335 = dma.done.wait [#allocation3], 512  }
  0x1a   :  { %336 = vsyncadd [#allocation3], 4294966784 }
  0x1b   :  { %337 = dma.done.wait [#allocation6], 512  }
  0x1c   :  { %338 = vsyncadd [#allocation6], 4294966784  ;;  %v267_v0 = vld [vmem:[#allocation5 + $0x18] sm:$0xff]   ;;  %v268_v1 = vld [vmem:[#allocation5 + $0x10] sm:$0xff]   ;;  %vm111_vm0 = vcmask 523264   ;;  %s345_s24 = smov [#allocation7]  }
  0x1d   :  { %236 = vmatprep.subr.bf16.mxu0 %v267_v0  ;;  %252 = vmatprep.subr.bf16.mxu1 %v267_v0  ;;  %v269_v2 = vld [vmem:[#allocation5 + $0x8] sm:$0xff]   ;;  %v271_v3 = vld [vmem:[#allocation2] sm:$0xff]   ;;  %v272_v4 = vld [vmem:[#allocation2 + $0x10] sm:$0xff]   ;;  %s202_s25 = sshll.u32 %s345_s24, 4  ;;  %s203_s25 = int_to_ptr.vmem [resolvable:$true] %s202_s25 }
  0x1e   :  { %237 = vmatpush3.bf16.msra.mxu0 %v267_v0  ;;  %256 = vmatpush3.bf16.msra.mxu1 %v267_v0  ;;  %v270_v5 = vld [vmem:[#allocation5] sm:$0xff]   ;;  %v273_v6 = vld [vmem:[#allocation2 + $0x8] sm:$0xff]   ;;  %v274_v7 = vld [vmem:[#allocation2 + $0x18] sm:$0xff]   ;;  %p320_p11 = scmp.lt.s32.totalorder %s203_s25, %s203_s25 }
  0x1f   :  { %238 = vmatprep.subr.bf16.mxu0 %v268_v1  ;;  %253 = vmatprep.subr.bf16.mxu1 %v268_v1  ;;  %v215_v8 = vld [vmem:[%s386_s2] ss:$0 sm:$0xff]  ;;  %s315_s2 = scalar_lea.vmem %s203_s25, 1024 }
  0x20   :  { %244 = vmatprep.mubr.msk.bf16.mxu0 %vm111_vm0, %v271_v3  ;;  %248 = vmatprep.mubr.msk.bf16.mxu1 %vm111_vm0, %v272_v4  ;;  %p316_p10 = scmp.ne.s32.totalorder %s203_s25, %s315_s2  ;;  %p321_p12 = scmp.lt.s32.totalorder %s315_s2, %s315_s2 }
  0x22   :  { %239 = vmatpush3.bf16.msra.mxu0 %v268_v1  ;;  %257 = vmatpush3.bf16.msra.mxu1 %v268_v1  ;;  %p322_p13 = por %p321_p12, %p320_p11 }
  0x23   :  { %240 = vmatprep.subr.bf16.mxu0 %v269_v2  ;;  %254 = vmatprep.subr.bf16.mxu1 %v269_v2 }
  0x24   :  { %p323_p0 = pnand %p322_p13, %p316_p10 }
  0x26   :  { %241 = vmatpush3.bf16.msra.mxu0 %v269_v2  ;;  %258 = vmatpush3.bf16.msra.mxu1 %v269_v2 }
  0x27   :  { %242 = vmatprep.subr.bf16.mxu0 %v270_v5  ;;  %255 = vmatprep.subr.bf16.mxu1 %v270_v5 }
  0x2a   :  { %243 = vmatpush3.bf16.msra.mxu0 %v270_v5  ;;  %259 = vmatpush3.bf16.msra.mxu1 %v270_v5 }
  0x2d   :  { %245 = vmatmul.mubr.msk.bf16.vlgmr.msra.gmra.mxu0 %vm111_vm0, %v273_v6  ;;  %249 = vmatmul.mubr.msk.bf16.vlgmr.msra.gmra.mxu1 %vm111_vm0, %v274_v7 }
  0xed   :  { %v246_v9 = vpop.f32.mrf.mxu0  ;;  %v250_v10 = vpop.f32.mrf.mxu1 }
  0xee   :  { %v167_v11 = vadd.f32 %v246_v9, %v215_v8  ;;  %v183_v12 = vadd.f32 %v250_v10, %v215_v8 }
  0xef   :  { %v158_v13 = vpop.f32.mrf.mxu0  ;;  %v174_v14 = vpop.f32.mrf.mxu1 }
  0xf0   :  { %191 = vst [vmem:[#allocation7 + $0x10] sm:$0xff] %v167_v11  ;;  %195 = vst [vmem:[#allocation7 + $0x30] sm:$0xff] %v183_v12  ;;  %v159_v15 = vadd.f32 %v215_v8, %v158_v13  ;;  %v175_v16 = vadd.f32 %v215_v8, %v174_v14 }
  0xf1   :  { %v247_v17 = vpop.f32.mrf.mxu0  ;;  %v251_v18 = vpop.f32.mrf.mxu1 }
  0xf2   :  { %189 = vst [vmem:[#allocation7] sm:$0xff] %v159_v15  ;;  %193 = vst [vmem:[#allocation7 + $0x20] sm:$0xff] %v175_v16  ;;  %v170_v19 = vadd.f32 %v247_v17, %v215_v8  ;;  %v186_v20 = vadd.f32 %v251_v18, %v215_v8 }
  0xf3   :  { %v161_v21 = vpop.f32.mrf.mxu0  ;;  %v177_v22 = vpop.f32.mrf.mxu1 }
  0xf4   :  { %192 = vst [vmem:[#allocation7 + $0x18] sm:$0xff] %v170_v19  ;;  %196 = vst [vmem:[#allocation7 + $0x38] sm:$0xff] %v186_v20  ;;  %v162_v23 = vadd.f32 %v215_v8, %v161_v21  ;;  %v178_v24 = vadd.f32 %v215_v8, %v177_v22 }
  0xf6   :  { %190 = vst [vmem:[#allocation7 + $0x8] sm:$0xff] %v162_v23  ;;  %194 = vst [vmem:[#allocation7 + $0x28] sm:$0xff] %v178_v24 }
  0xf7   :  { %326 = shalt.err (!%p323_p0)
}
  0xf8   :  { %s346_s26 = smov 128   ;;  %s347_s27 = smov 8  }
  0xf9   :  { %208 = dma.vmem_to_hbm [thread:$0]  %s203_s25, 1024, %s387_s3, [#allocation4], %s346_s26, %s346_s26, %s347_s27  }
  0xfa   :  { %339 = dma.done.wait [#allocation4], 1024  }
  0xfb   :  { %340 = vsyncadd [#allocation4], 4294966272 }
  0xfc   :  { %212 = vsyncpa [#allocation3], 1 }
  0xfd   :  { %213 = vsyncpa [#allocation6], 1 }
  0xfe   :  { %214 = vsyncpa [#allocation4], 1 }

</bundles_post_ra>
